<compile_context>
chip_gen: v7x
topology: tpu7x:2x2x1
jax: 0.10.0
libtpu: 0.0.40
codegen_flags: <defaults>
</compile_context>

<pallas_src>
import jax
import jax.numpy as jnp
from jax.experimental import pallas as pl
from jax.experimental.pallas import tpu as pltpu


def _round_up(x, m):
    return ((x + m - 1) // m) * m


def _time_decoder_kernel(enc_ref, halo_ref, w_ref, out_ref):
    """One tile of TILE_T frames -> TILE_T hop-size output chunks.

    enc_ref : [B, TILE_T, Mp] bf16  augmented frames [enc*norm, norm, zero-pad]
    halo_ref: [B, HALO,   Mp] bf16  the HALO frames preceding this tile
                                    (zeros before frame 0)
    w_ref   : [Mp, N]         bf16  [W^T ; b] / r, zero-padded rows
    out_ref : [B, TILE_T, O]  f32   hop-size chunks of the output signal
    """
    B, TT, Mp = enc_ref.shape
    N = w_ref.shape[1]
    O = out_ref.shape[2]
    r = N // O                      # overlap ratio (static)
    HALO = halo_ref.shape[1]

    # Linear layer (+ bias + norm + 1/r, all folded into the operands):
    # one MXU-shaped matmul per tile, bf16 inputs, f32 accumulation.
    x = jnp.dot(enc_ref[...].reshape(B * TT, Mp), w_ref[...],
                preferred_element_type=jnp.float32).reshape(B, TT, N)

    # Overlap-add: chunk t = sum_k frame(t-k)[k*O:(k+1)*O].
    acc = x[:, :, 0:O]                                   # k = 0 term
    if r > 1:
        # Recompute the previous tile's tail frames from the tiny halo block
        # (instead of carrying them in scratch) -> no cross-step dependency.
        xh = jnp.dot(halo_ref[...].reshape(B * HALO, Mp), w_ref[...],
                     preferred_element_type=jnp.float32).reshape(B, HALO, N)
        for k in range(1, r):                            # r is tiny (2 in prod)
            shifted = jnp.concatenate(
                [xh[:, HALO - k:, k * O:(k + 1) * O],    # frames t-k < 0 of this tile
                 x[:, :TT - k, k * O:(k + 1) * O]],      # frames t-k >= 0
                axis=1)
            acc = acc + shifted
    out_ref[...] = acc.astype(out_ref.dtype)


def time_decoder_forward(waveform_encoding, waveform_norm, weight, bias,
                         N, O, waveform_length=None, tile_t=None,
                         compute_dtype=jnp.bfloat16):
    """waveform_encoding: [B, T, M], waveform_norm: [B, T, 1] -> [B, L] (f32)."""
    B, T, M = waveform_encoding.shape
    assert N % O == 0, "TimeDecoder kernel assumes frame size N is a multiple of hop O"
    r = N // O
    L = (T - 1) * O + N
    num_chunks = T + r - 1                  # == L // O
    HALO = _round_up(max(r - 1, 1), 8)      # halo frames per tile (>= r-1, sublane aligned)
    Mp = _round_up(M + 1, 128)              # +1 fused norm column, lane-padded

    itemsize = jnp.dtype(compute_dtype).itemsize
    lane = lambda v: _round_up(v, 128)

    # Generation-aware VMEM budget (3/4 of physical VMEM).
    try:
        vmem_cap = int(getattr(pltpu.get_tpu_info(), "vmem_capacity_bytes", 64 << 20))
    except Exception:
        vmem_cap = 64 << 20
    vmem_budget = (vmem_cap * 3) // 4

    def footprint(tt):
        return (2 * B * tt * Mp * itemsize          # enc blocks (double-buffered)
                + 2 * B * HALO * Mp * itemsize      # halo blocks
                + 2 * Mp * lane(N) * itemsize       # fused weight
                + 2 * B * tt * lane(O) * 4          # out blocks (f32)
                + 2 * B * tt * lane(N) * 4)         # x / acc f32 temporaries

    if tile_t is None:
        tile_t = 256                # TODO(synk): sweep up to 512 on v5e/v6e (128 MiB VMEM)
    tile_t = _round_up(max(tile_t, HALO), HALO)
    tile_t = min(tile_t, _round_up(num_chunks, HALO))
    while tile_t > HALO and 2 * footprint(tile_t) > vmem_budget:
        tile_t = max(HALO, _round_up(tile_t // 2, HALO))
    assert r - 1 < tile_t

    Tp = _round_up(num_chunks, tile_t)      # padded frame/chunk count
    num_tiles = Tp // tile_t
    vmem_limit = int(min(max(2 * footprint(tile_t), 16 << 20), vmem_budget))

    f32 = jnp.float32
    enc = waveform_encoding.astype(f32)
    norm = waveform_norm.astype(f32)

    # Fold bias + per-frame norm + the 1/r overlap-add normalization into the
    # matmul operands:  ((enc @ W^T + b) * norm) / r == [enc*norm, norm] @ [W^T ; b]/r.
    # Zero-padded frames (>= T) are all-zero rows -> contribute nothing.
    enc_aug = jnp.concatenate([enc * norm, norm], axis=-1)            # [B, T, M+1]
    enc_aug = jnp.pad(enc_aug, ((0, 0), (0, Tp - T), (0, Mp - (M + 1))))
    enc_aug = enc_aug.astype(compute_dtype)                            # [B, Tp, Mp]

    w_aug = jnp.concatenate([weight.T.astype(f32),
                             bias.reshape(1, N).astype(f32)], axis=0) / r
    w_aug = jnp.pad(w_aug, ((0, Mp - (M + 1)), (0, 0))).astype(compute_dtype)  # [Mp, N]

    # Halo frames: for tile i, the HALO frames preceding frame i*tile_t
    # (zeros before frame 0).  Compacted to [B, num_tiles*HALO, Mp].
    halo_all = jnp.pad(enc_aug, ((0, 0), (HALO, 0), (0, 0)))[:, :Tp, :]
    halo = halo_all.reshape(B, num_tiles, tile_t, Mp)[:, :, :HALO, :]
    halo = halo.reshape(B, num_tiles * HALO, Mp)

    out = pl.pallas_call(
        _time_decoder_kernel,
        out_shape=jax.ShapeDtypeStruct((B, Tp, O), f32),
        grid=(num_tiles,),
        in_specs=[
            pl.BlockSpec((B, tile_t, Mp), lambda i: (0, i, 0)),   # frame tile
            pl.BlockSpec((B, HALO, Mp), lambda i: (0, i, 0)),     # halo frames
            pl.BlockSpec((Mp, N), lambda i: (0, 0)),              # fused weight (full)
        ],
        out_specs=pl.BlockSpec((B, tile_t, O), lambda i: (0, i, 0)),
        compiler_params=pltpu.CompilerParams(
            dimension_semantics=("parallel",),   # no cross-step carry -> megacore safe
            vmem_limit_bytes=vmem_limit),
    )(enc_aug, halo, w_aug)

    # Free row-major collapse of trailing dims; trim the zero-padded chunks.
    signal = out.reshape(B, Tp * O)[:, :L]

    if waveform_length is not None:
        pad = waveform_length - signal.shape[-1]
        if pad >= 0:
            signal = jnp.pad(signal, ((0, 0), (0, pad)))
        else:
            signal = signal[:, :waveform_length]
    return signal


def _reference_forward(waveform_encoding, waveform_norm, weight, bias, N, O):
    """Pure-jnp f32 reference matching the PyTorch module."""
    B, T, M = waveform_encoding.shape
    x = jnp.einsum("btm,nm->btn", waveform_encoding, weight) + bias  # [B, T, N]
    x = x * waveform_norm
    r = N // O
    ov = N // r
    L = (T - 1) * ov + N
    sig = jnp.zeros((B, L), dtype=x.dtype)
    for i in range(T):
        sig = sig.at[:, i * ov:i * ov + N].add(x[:, i, :])
    return sig / r


if __name__ == "__main__":
    # Small shapes consistent with the module (frame size N, hop O, feature dim M).
    # tile_t=16 gives 3 grid tiles so the cross-tile halo path is exercised.
    B, T, M, N, O = 2, 40, 32, 16, 8
    tile_t = 16

    key = jax.random.PRNGKey(0)
    k_enc, k_norm, k_w, k_b = jax.random.split(key, 4)

    waveform_encoding = jax.random.normal(k_enc, (B, T, M), dtype=jnp.float32)
    waveform_norm = jax.random.uniform(k_norm, (B, T, 1), dtype=jnp.float32,
                                       minval=0.5, maxval=2.0)

    # nn.Linear(M, N) parameters: weight [N, M], bias [N], U(-1/sqrt(M), 1/sqrt(M)).
    bound = 1.0 / (M ** 0.5)
    weight = jax.random.uniform(k_w, (N, M), dtype=jnp.float32,
                                minval=-bound, maxval=bound)
    bias = jax.random.uniform(k_b, (N,), dtype=jnp.float32,
                              minval=-bound, maxval=bound)

    out = time_decoder_forward(waveform_encoding, waveform_norm, weight, bias,
                               N, O, tile_t=tile_t)
    out = jax.block_until_ready(out)

    ref = _reference_forward(waveform_encoding, waveform_norm, weight, bias, N, O)
    assert out.shape == ref.shape, (out.shape, ref.shape)
    # bf16 MXU operands with f32 accumulation -> loosened tolerance vs f32 reference.
    max_err = float(jnp.max(jnp.abs(out - ref)))
    assert jnp.allclose(out, ref, atol=5e-2, rtol=5e-2), max_err

    print("KERNEL_OK")
</pallas_src>

<mosaic_0001>
module attributes {stable_mosaic.version = 11 : i64} {
  func.func @_time_decoder_kernel(%arg0: i32, %arg1: memref<2x16x128xbf16, #tpu.memory_space<vmem>>, %arg2: memref<2x8x128xbf16, #tpu.memory_space<vmem>>, %arg3: memref<128x16xbf16, #tpu.memory_space<vmem>>, %arg4: memref<2x16x8xf32, #tpu.memory_space<vmem>>) attributes {dimension_semantics = [#tpu.dimension_semantics<parallel>], iteration_bounds = array<i64: 3>, scalar_prefetch = 0 : i64, scratch_operands = 0 : i64, tpu.core_type = #tpu.core_type<tc>, window_params = [{transform_indices = @transform_0, window_bounds = array<i64: 2, 16, 128>}, {transform_indices = @transform_1, window_bounds = array<i64: 2, 8, 128>}, {pipeline_mode = #tpu.pipeline_mode<synchronous>, transform_indices = @transform_2, window_bounds = array<i64: 128, 16>}, {transform_indices = @transform_3, window_bounds = array<i64: 2, 16, 8>}]} {
    %c0 = arith.constant 0 : index
    %c0_0 = arith.constant 0 : index
    %c0_1 = arith.constant 0 : index
    %0 = vector.load %arg1[%c0, %c0_0, %c0_1] : memref<2x16x128xbf16, #tpu.memory_space<vmem>>, vector<2x16x128xbf16>
    %1 = vector.shape_cast %0 : vector<2x16x128xbf16> to vector<32x128xbf16>
    %c0_2 = arith.constant 0 : index
    %c0_3 = arith.constant 0 : index
    %2 = vector.load %arg3[%c0_2, %c0_3] : memref<128x16xbf16, #tpu.memory_space<vmem>>, vector<128x16xbf16>
    %cst = arith.constant dense<0.000000e+00> : vector<32x16xf32>
    %3 = tpu.matmul %1, %2, %cst {dimension_numbers = #tpu.dot_dimension_numbers<[1], [0], [0], [1], [0, 0, 1, 1], [], []>} : vector<32x128xbf16>, vector<128x16xbf16>, vector<32x16xf32> -> vector<32x16xf32>
    %4 = vector.shape_cast %3 : vector<32x16xf32> to vector<2x16x16xf32>
    %5 = vector.extract_strided_slice %4 {offsets = [0, 0, 0], sizes = [2, 16, 8], strides = [1, 1, 1]} : vector<2x16x16xf32> to vector<2x16x8xf32>
    %c0_4 = arith.constant 0 : index
    %c0_5 = arith.constant 0 : index
    %c0_6 = arith.constant 0 : index
    %6 = vector.load %arg2[%c0_4, %c0_5, %c0_6] : memref<2x8x128xbf16, #tpu.memory_space<vmem>>, vector<2x8x128xbf16>
    %7 = vector.shape_cast %6 : vector<2x8x128xbf16> to vector<16x128xbf16>
    %c0_7 = arith.constant 0 : index
    %c0_8 = arith.constant 0 : index
    %8 = vector.load %arg3[%c0_7, %c0_8] : memref<128x16xbf16, #tpu.memory_space<vmem>>, vector<128x16xbf16>
    %cst_9 = arith.constant dense<0.000000e+00> : vector<16x16xf32>
    %9 = tpu.matmul %7, %8, %cst_9 {dimension_numbers = #tpu.dot_dimension_numbers<[1], [0], [0], [1], [0, 0, 1, 1], [], []>} : vector<16x128xbf16>, vector<128x16xbf16>, vector<16x16xf32> -> vector<16x16xf32>
    %10 = vector.shape_cast %9 : vector<16x16xf32> to vector<2x8x16xf32>
    %11 = vector.extract_strided_slice %10 {offsets = [0, 7, 8], sizes = [2, 1, 8], strides = [1, 1, 1]} : vector<2x8x16xf32> to vector<2x1x8xf32>
    %12 = vector.extract_strided_slice %4 {offsets = [0, 0, 8], sizes = [2, 15, 8], strides = [1, 1, 1]} : vector<2x16x16xf32> to vector<2x15x8xf32>
    %13 = tpu.concatenate %11, %12 in 1 : vector<2x1x8xf32>, vector<2x15x8xf32> -> vector<2x16x8xf32>
    %14 = arith.addf %5, %13 : vector<2x16x8xf32>
    %c0_10 = arith.constant 0 : index
    %c0_11 = arith.constant 0 : index
    %c0_12 = arith.constant 0 : index
    %15 = vector.load %arg4[%c0_10, %c0_11, %c0_12] : memref<2x16x8xf32, #tpu.memory_space<vmem>>, vector<2x16x8xf32>
    tpu.vector_store %arg4[%c0_10, %c0_11, %c0_12], %14 {strides = array<i32>} : memref<2x16x8xf32, #tpu.memory_space<vmem>>, vector<2x16x8xf32>,
    return
  }
  func.func @transform_0(%arg0: i32) -> (i32, i32, i32) {
    %c0_i32 = arith.constant 0 : i32
    %c0_i32_0 = arith.constant 0 : i32
    %c0_i32_1 = arith.constant 0 : i32
    return %c0_i32, %arg0, %c0_i32_0 : i32, i32, i32
  }
  func.func @transform_1(%arg0: i32) -> (i32, i32, i32) {
    %c0_i32 = arith.constant 0 : i32
    %c0_i32_0 = arith.constant 0 : i32
    %c0_i32_1 = arith.constant 0 : i32
    return %c0_i32, %arg0, %c0_i32_0 : i32, i32, i32
  }
  func.func @transform_2(%arg0: i32) -> (i32, i32) {
    %c0_i32 = arith.constant 0 : i32
    %c0_i32_0 = arith.constant 0 : i32
    %c0_i32_1 = arith.constant 0 : i32
    return %c0_i32, %c0_i32_0 : i32, i32
  }
  func.func @transform_3(%arg0: i32) -> (i32, i32, i32) {
    %c0_i32 = arith.constant 0 : i32
    %c0_i32_0 = arith.constant 0 : i32
    %c0_i32_1 = arith.constant 0 : i32
    return %c0_i32, %arg0, %c0_i32_0 : i32, i32, i32
  }
}

</mosaic_0001>

<bundles_post_ra>
// kernel: tpu_custom_call.1
= control target key start
LH: loop header
LB: loop body
LE: loop exit
PB: predicated region body
PF: predicated region fallthrough
CT: control target
= control target key end

     0   :  { %s812_s12 = smov 0   ;;  %s814_s13 = smov 0   ;;  %s914_s0 = inlined_call_operand.vmem [shape: bf16[2,48,128], index: 0, kind: input, shape index: {}]   ;;  %s915_s1 = inlined_call_operand.vmem [shape: bf16[2,24,128], index: 1, kind: input, shape index: {}]   ;;  %s916_s2 = inlined_call_operand.vmem [shape: bf16[128,16], index: 2, kind: input, shape index: {}]   ;;  %s917_s3 = inlined_call_operand.vmem [shape: f32[2,48,8], index: 3, kind: output, shape index: {}]  }
   0x1   :  { %s816_s14 = smov 0  }
   0x2 LB: > { %s637_s15 = sadd.s32 4294967295, %s787_s14   ;;  %s829_s16 = sadd.s32 1, %s787_s14   ;;  %s787_s14 = sphi %s816_s14, %s922_s14   ;;  %s783_s13 = sphi %s814_s13, %s921_s13   ;;  %s779_s12 = sphi %s812_s12, %s920_s12  }
   0x3   : > { %s17_s17 = ssub.s32 %s787_s14, %s829_s16  ;;  %s20_s18 = sadd.s32 1, %s783_s13 }
   0x4   : > { %p18_p0 = scmp.eq.s32.totalorder %s17_s17, 0  ;;  %p27_p1 = scmp.ne.s32.totalorder %s783_s13, %s779_s12 }
   0x5   : > { %p28_p2 = scmp.eq.s32.totalorder %s787_s14, 0  ;;  %p104_p3 = scmp.eq.s32.totalorder %s637_s15, 2 }
   0x6   : > { %s840_s19 = scalar_select %p18_p0, %s783_s13, %s20_s18  }
   0x7   : > { %p842_p4 = por %p28_p2, %p27_p1  ;;  %p846_p5 = por %p104_p3, %p27_p1 }
   0x8   : > { %p640_p6 = scmp.ge.s32.totalorder %s787_s14, 3 }
   0xa   : > { %129 = sbr.rel (%p640_p6) target bundleno = 31 (0x1f), region = 20 }
  0x11   : > { %132 = sbr.rel (!%p842_p4) target bundleno = 24 (0x18), region = 24  ;;  %s134_s22 = sand.u32 (%p842_p4), 1, %s783_s13  }
  0x12   : > { %s666_s23 = sshll.u32 (%p842_p4), %s787_s14, 3  ;;  %s641_s24 = sshll.u32 (%p842_p4), %s134_s22, 4 }
  0x13   : > { %s139_s27 = scalar_lea.vmem (%p842_p4), %s914_s0, %s666_s23  ;;  %s136_s28 = scalar_lea.vmem (%p842_p4), [#allocation2], %s641_s24 }
  0x14   : > { %v155_v0 = vld [vmem:[%s139_s27] sm:$0xff] (%p842_p4)   ;;  %v159_v1 = vld [vmem:[%s139_s27 + $0x18] sm:$0xff] (%p842_p4)  }
  0x15   : > { %156 = vst [vmem:[%s136_s28] sm:$0xff] (%p842_p4), %v155_v0   ;;  %160 = vst [vmem:[%s136_s28 + $0x8] sm:$0xff] (%p842_p4), %v159_v1  }
  0x18 PF: > { %193 = sbr.rel (!%p842_p4) target bundleno = 31 (0x1f), region = 65  ;;  %s195_s29 = sand.u32 (%p842_p4), 1, %s783_s13  }
  0x19   : > { %s645_s30 = sshll.u32 (%p842_p4), %s787_s14, 2  ;;  %s644_s4 = sshll.u32 (%p842_p4), %s195_s29, 3 }
  0x1a   : > { %s199_s7 = scalar_lea.vmem (%p842_p4), %s915_s1, %s645_s30  ;;  %s197_s8 = scalar_lea.vmem (%p842_p4), [#allocation3], %s644_s4 }
  0x1b   : > { %v215_v2 = vld [vmem:[%s199_s7] sm:$0xf] (%p842_p4)  ;;  %v217_v3 = vld [vmem:[%s199_s7 + $0xc] sm:$0xf] (%p842_p4) }
  0x1c   : > { %216 = vst [vmem:[%s197_s8] sm:$0xf] (%p842_p4), %v215_v2  ;;  %218 = vst [vmem:[%s197_s8 + $0x4] sm:$0xf] (%p842_p4), %v217_v3 }
  0x1f PF: > { %p646_p7 = scmp.ge.s32.totalorder %s787_s14, 1  ;;  %p244_p8 = scmp.lt.s32.totalorder %s787_s14, 4 }
  0x21   : > { %p245_p9 = pnand %p646_p7, %p244_p8 }
  0x22   : > { %v754_v4 = vld [vmem:[%s916_s2] sm:$0xff] (!%p245_p9)   ;;  %v789_v5 = vmov (!%p245_p9), 0.0   ;;  %v755_v6 = vld [vmem:[%s916_s2 + $0x8] sm:$0xff] (!%p245_p9)   ;;  %s874_s18 = sand.u32 (!%p245_p9), 1, %s779_s12   ;;  %v756_v7 = vld [vmem:[%s916_s2 + $0x10] sm:$0xff] (!%p245_p9)   ;;  %vm790_vm0 = vmmov (!%p245_p9), 0  }
  0x23   : > { %248 = sbr.rel (%p245_p9) target bundleno = 414 (0x19e), region = 106  ;;  %707 = vmatprep.subr.bf16.mxu1 (!%p245_p9), %v789_v5  ;;  %687 = vmatprep.subr.bf16.mxu0 (!%p245_p9), %v754_v4  ;;  %s647_s20 = sshll.u32 (!%p245_p9), %s874_s18, 4  ;;  %v757_v8 = vld [vmem:[%s916_s2 + $0x18] sm:$0xff] (!%p245_p9)   ;;  %v758_v10 = vld [vmem:[%s916_s2 + $0x20] sm:$0xff] (!%p245_p9)   ;;  %v759_v11 = vld [vmem:[%s916_s2 + $0x28] sm:$0xff] (!%p245_p9)   ;;  %vm475_vm1 = vcmask (!%p245_p9), 1040384  }
  0x24   : > { %708 = vmatpush3.bf16.msra.mxu1 (!%p245_p9), %v754_v4  ;;  %688 = vmatpush3.bf16.msra.mxu0 (!%p245_p9), %v754_v4  ;;  %s648_s24 = sshll.u32 (!%p245_p9), %s874_s18, 3  ;;  %s253_s12 = scalar_lea.vmem (!%p245_p9), [#allocation2], %s647_s20  ;;  %v760_v12 = vld [vmem:[%s916_s2 + $0x30] sm:$0xff] (!%p245_p9)   ;;  %v761_v13 = vld [vmem:[%s916_s2 + $0x38] sm:$0xff] (!%p245_p9)   ;;  %vm504_vm2 = vcmask (!%p245_p9), 64512  }
  0x25   : > { %709 = vmatprep.subr.bf16.mxu1 (!%p245_p9), %v789_v5  ;;  %689 = vmatprep.subr.bf16.mxu0 (!%p245_p9), %v755_v6  ;;  %v762_v9 = vld [vmem:[%s253_s12] sm:$0xff] (!%p245_p9)   ;;  %s260_s27 = scalar_lea.vmem (!%p245_p9), [#allocation3], %s648_s24  ;;  %v764_v15 = vld [vmem:[%s253_s12 + $0x8] sm:$0xff] (!%p245_p9)   ;;  %s791_s9 = smov (!%p245_p9), 120  }
  0x26   : > { %723 = vmatprep.mubr.msk.bf16.mxu1 (!%p245_p9), %vm790_vm0, %v789_v5  ;;  %703 = vmatprep.mubr.bf16.mxu0 (!%p245_p9), %v762_v9  ;;  %v763_v14 = vld [vmem:[%s260_s27] sm:$0xff] (!%p245_p9)   ;;  %s649_s10 = sshll.u32 (!%p245_p9), %s874_s18, 5 }
  0x27   : > { %s283_s11 = scalar_lea.vmem (!%p245_p9), [#allocation4], %s649_s10 }
  0x28   : > { %710 = vmatpush3.bf16.msra.mxu1 (!%p245_p9), %v755_v6  ;;  %690 = vmatpush3.bf16.msra.mxu0 (!%p245_p9), %v755_v6 }
  0x29   : > { %711 = vmatprep.subr.bf16.mxu1 (!%p245_p9), %v789_v5  ;;  %691 = vmatprep.subr.bf16.mxu0 (!%p245_p9), %v756_v7 }
  0x2a   : > { %s667_s17 = sshll.u32 (%p846_p5), %s637_s15, 4 }
  0x2b   : > { %s518_s22 = scalar_lea.vmem (%p846_p5), %s917_s3, %s667_s17 }
  0x2c   : > { %712 = vmatpush3.bf16.msra.mxu1 %v756_v7  ;;  %692 = vmatpush3.bf16.msra.mxu0 %v756_v7 }
  0x2d   : > { %713 = vmatprep.subr.bf16.mxu1 %v789_v5  ;;  %693 = vmatprep.subr.bf16.mxu0 %v757_v8 }
  0x30   : > { %714 = vmatpush3.bf16.msra.mxu1 %v757_v8  ;;  %694 = vmatpush3.bf16.msra.mxu0 %v757_v8 }
  0x31   : > { %715 = vmatprep.subr.bf16.mxu1 %v789_v5  ;;  %695 = vmatprep.subr.bf16.mxu0 %v758_v10 }
  0x34   : > { %716 = vmatpush3.bf16.msra.mxu1 %v758_v10  ;;  %696 = vmatpush3.bf16.msra.mxu0 %v758_v10 }
  0x35   : > { %717 = vmatprep.subr.bf16.mxu1 %v789_v5  ;;  %697 = vmatprep.subr.bf16.mxu0 %v759_v11 }
  0x38   : > { %718 = vmatpush3.bf16.msra.mxu1 %v759_v11  ;;  %698 = vmatpush3.bf16.msra.mxu0 %v759_v11 }
  0x39   : > { %719 = vmatprep.subr.bf16.mxu1 %v789_v5  ;;  %699 = vmatprep.subr.bf16.mxu0 %v760_v12 }
  0x3c   : > { %720 = vmatpush3.bf16.msra.mxu1 %v760_v12  ;;  %700 = vmatpush3.bf16.msra.mxu0 %v760_v12 }
  0x3d   : > { %721 = vmatprep.subr.bf16.mxu1 %v789_v5  ;;  %701 = vmatprep.subr.bf16.mxu0 %v761_v13 }
  0x40   : > { %722 = vmatpush3.bf16.msra.mxu1 %v761_v13  ;;  %702 = vmatpush3.bf16.msra.mxu0 %v761_v13 }
  0x43   : > { %724 = vmatmul.mubr.bf16.vlgmr.msra.gmra.mrb[0].mxu1 %v763_v14  ;;  %704 = vmatmul.mubr.bf16.vlgmr.msra.gmra.mrb[0].mxu0 %v764_v15 }
 0x116   : > { %v458_v16 = vpop.f32.mrb[0].mxu1  ;;  %v705_v17 = vpop.f32.mrb[0].mxu0 }
 0x117   : > { %v725_v18 = vpop.f32.mrb[1].mxu1  ;;  %v479_v19 = vrot.slane %v705_v17, 7  ;;  %v401_v20 = vpop.f32.mrb[1].mxu0  ;;  %v467_v22 = vrot.slane %v458_v16, 7 }
 0x118   : > { %v461_v21 = vpop.f32.mrb[2].mxu1  ;;  %v476_v23 = vrot.slane %v401_v20, 7  ;;  %v706_v25 = vpop.f32.mrb[2].mxu0 }
 0x119   : > { %v468_v24 = vrot.slane %v461_v21, 7  ;;  %v726_v26 = vpop.f32.mrb[3].mxu1  ;;  %v480_v27 = vrot.slane %v706_v25, 7  ;;  %v404_v28 = vpop.f32.mrb[3].mxu0 }
 0x11a   : > { %v477_v29 = vrot.slane %v404_v28, 7  ;;  %v484_v31 = vsel %vm475_vm1, %v467_v22, %v476_v23 }
 0x11b   : > { %v485_v30 = vsel %vm475_vm1, %v468_v24, %v479_v19  ;;  %488 = vrot.lane.b32.xlu0 %v484_v31, %s791_s9  ;;  %v481_v32 = vsel %vm475_vm1, %v479_v19, %v480_v27 }
 0x11c   : > { %492 = vrot.lane.b32.xlu1 %v485_v30, %s791_s9  ;;  %v478_v33 = vsel %vm475_vm1, %v476_v23, %v477_v29 }
 0x11f   : > { %490 = vrot.lane.b32.xlu0 %v478_v33, %s791_s9 }
 0x120   : > { %494 = vrot.lane.b32.xlu1 %v481_v32, %s791_s9 }
 0x18d   : > { %v489_v35 = vpop.permute.xlu0 %488 }
 0x18e   : > { %v493_v34 = vpop.permute.xlu1 %492  ;;  %v500_v37 = vadd.f32 %v489_v35, %v401_v20 }
 0x18f   : > { %v502_v36 = vadd.f32 %v705_v17, %v493_v34  ;;  %515 = sbr.rel (!%p846_p5) target bundleno = 414 (0x19e), region = 118 }
 0x190   : > { %505 = vst.msk [vmem:[%s283_s11] sm:$0xff] %vm504_vm2, %v500_v37 }
 0x191   : > { %507 = vst.msk [vmem:[%s283_s11 + $0x10] sm:$0xff] %vm504_vm2, %v502_v36  ;;  %v491_v39 = vpop.permute.xlu0 %490 }
 0x192   : > { %v495_v38 = vpop.permute.xlu1 %494  ;;  %v501_v41 = vadd.f32 %v491_v39, %v404_v28 }
 0x193   : > { %v503_v40 = vadd.f32 %v706_v25, %v495_v38 }
 0x194   : > { %506 = vst.msk [vmem:[%s283_s11 + $0x8] sm:$0xff] %vm504_vm2, %v501_v41 }
 0x195   : > { %508 = vst.msk [vmem:[%s283_s11 + $0x18] sm:$0xff] %vm504_vm2, %v503_v40 }
 0x197   : > { %v552_v42 = vld [vmem:[%s283_s11] sm:$0xff] }
 0x198   : > { %v556_v44 = vld [vmem:[%s283_s11 + $0x10] sm:$0xff]  ;;  %553 = vst [vmem:[%s518_s22] sm:$0xff] %v552_v42 }
 0x199   : > { %557 = vst [vmem:[%s518_s22 + $0x30] sm:$0xff] %v556_v44 }
 0x19b   : > { %v554_v43 = vld [vmem:[%s283_s11 + $0x8] sm:$0xff] }
 0x19c   : > { %v558_v45 = vld [vmem:[%s283_s11 + $0x18] sm:$0xff]  ;;  %555 = vst [vmem:[%s518_s22 + $0x8] sm:$0xff] %v554_v43 }
 0x19d   : > { %559 = vst [vmem:[%s518_s22 + $0x38] sm:$0xff] %v558_v45 }
 0x19e PF: > { %p10_p10 = scmp.ge.s32.totalorder %s829_s16, 5   ;;  %s920_s12 = smov %s783_s13 }
 0x19f   : > { %s921_s13 = smov %s840_s19  ;;  %s922_s14 = smov %s829_s16 }
 0x1a0   :  { %12 = sbr.rel (!%p10_p10) target bundleno = 2 (0x2), region = 195 }

</bundles_post_ra>
